<compile_context>
chip_gen: v7x
topology: tpu7x:2x2x1
jax: 0.10.0
libtpu: 0.0.40
codegen_flags: <defaults>
</compile_context>

<pallas_src>
import math
from functools import partial

import jax
import jax.numpy as jnp
from jax.experimental import pallas as pl
from jax.experimental.pallas import tpu as pltpu


def _classifier_kernel(tok_ref, emb_w_ref, b_ref, o_ref):
    """Fused one-hot-counts matmul for the whole (tiny) batch.

    tok_ref   : (B*S, 1)   int32  flattened token ids
    emb_w_ref : (V, O_pad) f32    fused weight  (emb_table @ fc_w.T) / S, lane-padded
    b_ref     : (1, O_pad) f32    fc bias, lane-padded
    o_ref     : (B, O_pad) f32    logits (padded columns stay zero)
    """
    BS = tok_ref.shape[0]
    B = o_ref.shape[0]
    S = BS // B
    V = emb_w_ref.shape[0]

    # Clamp OOB ids (matches jnp.take clamp semantics; PyTorch would raise).
    tok = jnp.clip(tok_ref[...], 0, V - 1)                            # (BS, 1)

    # Lane-dense 2-D one-hot: onehot[n, v] = (tok[n] == v)
    vocab_iota = jax.lax.broadcasted_iota(jnp.int32, (BS, V), 1)
    onehot = (tok == vocab_iota).astype(jnp.float32)                  # (BS, V)

    # counts[b, v] = #{s : x[b, s] == v}; reshape only splits the leading dim
    # (lane dim unchanged), the reduce is a cheap XLU sublane reduction.
    counts = jnp.sum(onehot.reshape(B, S, V), axis=1)                 # (B, V)

    # Single MXU matmul (contraction K = V) + bias -> lane-dense (B, O_pad) store.
    logits = jnp.dot(counts, emb_w_ref[...],
                     preferred_element_type=jnp.float32) + b_ref[...]
    o_ref[...] = logits.astype(o_ref.dtype)


def prepare_classifier_params(emb_table, fc_w, fc_b, seq_len):
    """One-time (init-time) prep: fuse embedding table with the fc layer.

    Returns (emb_w, b_pad): emb_w is (V, O_pad) = (emb_table @ fc_w.T) / S with
    the output dim zero-padded to a 128-lane multiple; b_pad is (1, O_pad).
    """
    V, E = emb_table.shape
    O = fc_w.shape[0]
    O_pad = max(128, ((O + 127) // 128) * 128)

    fused = (emb_table.astype(jnp.float32) @ fc_w.astype(jnp.float32).T) * (1.0 / seq_len)
    emb_w = jnp.zeros((V, O_pad), jnp.float32).at[:, :O].set(fused)
    b_pad = jnp.zeros((1, O_pad), jnp.float32).at[0, :O].set(fc_b.astype(jnp.float32))
    return emb_w, b_pad


@partial(jax.jit, static_argnums=(3,))
def classifier_forward(tokens, emb_w, b_pad, out_dim):
    """tokens: (B, S) int; emb_w: (V, O_pad) fused weight; b_pad: (1, O_pad)."""
    B, S = tokens.shape
    V, O_pad = emb_w.shape

    # Dense 2-D token layout for the kernel (cheap reshape, no padding op).
    tok2 = tokens.astype(jnp.int32).reshape(B * S, 1)

    # Whole batch in a single grid step; "parallel" so megacore sharding applies
    # automatically if the batch axis is ever tiled.
    bt = B

    # Explicit scoped-VMEM budget: double-buffered blocks + headroom; tiny here,
    # but keeps the spec portable across v5e (16 MiB scoped default) and v7x
    # (64 MiB physical).
    block_bytes = (B * S * 4) + (V * O_pad * 4) + (O_pad * 4) + (bt * O_pad * 4)
    vmem_limit = int(max(4 * block_bytes, 4 * 1024 * 1024))

    grid_spec = pltpu.PrefetchScalarGridSpec(
        num_scalar_prefetch=0,
        grid=(pl.cdiv(B, bt),),
        in_specs=[
            pl.BlockSpec((bt * S, 1), lambda i: (i, 0)),       # token ids
            pl.BlockSpec((V, O_pad), lambda i: (0, 0)),        # fused weight
            pl.BlockSpec((1, O_pad), lambda i: (0, 0)),        # bias (padded)
        ],
        out_specs=pl.BlockSpec((bt, O_pad), lambda i: (i, 0)),
    )

    out_padded = pl.pallas_call(
        _classifier_kernel,
        out_shape=jax.ShapeDtypeStruct((B, O_pad), jnp.float32),
        grid_spec=grid_spec,
        compiler_params=pltpu.CompilerParams(
            dimension_semantics=("parallel",),
            vmem_limit_bytes=vmem_limit),
    )(tok2, emb_w, b_pad)

    return out_padded[:, :out_dim]


def reference(tokens, emb_table, fc_w, fc_b):
    """Pure-JAX mirror of MyClassifier.forward."""
    x = emb_table[tokens]           # embedding lookup (B, S, E)
    x = x.mean(axis=1)              # mean pool over sequence (B, E)
    return x @ fc_w.T + fc_b        # linear (B, O)


if __name__ == "__main__":
    B, S, V, E, O = 2, 8, 128, 32, 8   # batch, seq, vocab, embed_dim, output_dim

    root = jax.random.PRNGKey(0)
    k_tok, k_emb, k_w, k_b = jax.random.split(root, 4)

    tokens = jax.random.randint(k_tok, (B, S), 0, V, dtype=jnp.int32)
    emb_table = jax.random.normal(k_emb, (V, E), jnp.float32)
    fc_w = jax.random.normal(k_w, (O, E), jnp.float32) / math.sqrt(E)
    fc_b = jax.random.normal(k_b, (O,), jnp.float32) * 0.02

    # One-time parameter prep (module-init time, not per forward call).
    emb_w, b_pad = jax.block_until_ready(
        prepare_classifier_params(emb_table, fc_w, fc_b, S))

    out = classifier_forward(tokens, emb_w, b_pad, O)
    out = jax.block_until_ready(out)

    ref = jax.block_until_ready(reference(tokens, emb_table, fc_w, fc_b))

    assert out.shape == (B, O) and out.dtype == jnp.float32
    assert jnp.allclose(out, ref, rtol=1e-4, atol=1e-4), (
        f"max abs diff {jnp.max(jnp.abs(out - ref))}")
    print("KERNEL_OK")
</pallas_src>

<mosaic_0001>
module attributes {stable_mosaic.version = 11 : i64} {
  func.func @_classifier_kernel(%arg0: i32, %arg1: memref<16x1xi32, #tpu.memory_space<vmem>>, %arg2: memref<128x128xf32, #tpu.memory_space<vmem>>, %arg3: memref<1x128xf32, #tpu.memory_space<vmem>>, %arg4: memref<2x128xf32, #tpu.memory_space<vmem>>) attributes {dimension_semantics = [#tpu.dimension_semantics<parallel>], iteration_bounds = array<i64: 1>, scalar_prefetch = 0 : i64, scratch_operands = 0 : i64, tpu.core_type = #tpu.core_type<tc>, window_params = [{transform_indices = @transform_0, window_bounds = array<i64: 16, 1>}, {pipeline_mode = #tpu.pipeline_mode<synchronous>, transform_indices = @transform_1, window_bounds = array<i64: 128, 128>}, {pipeline_mode = #tpu.pipeline_mode<synchronous>, transform_indices = @transform_2, window_bounds = array<i64: 1, 128>}, {transform_indices = @transform_3, window_bounds = array<i64: 2, 128>}]} {
    %c0 = arith.constant 0 : index
    %c0_0 = arith.constant 0 : index
    %0 = vector.load %arg1[%c0, %c0_0] : memref<16x1xi32, #tpu.memory_space<vmem>>, vector<16x1xi32>
    %c0_i32 = arith.constant 0 : i32
    %c127_i32 = arith.constant 127 : i32
    %1 = vector.broadcast %c0_i32 : i32 to vector<16x1xi32>
    %2 = arith.maxsi %1, %0 : vector<16x1xi32>
    %3 = vector.broadcast %c127_i32 : i32 to vector<16x1xi32>
    %4 = arith.minsi %3, %2 : vector<16x1xi32>
    %5 = tpu.iota {dimensions = array<i32: 1>} : vector<16x128xi32>
    %6 = vector.broadcast %4 : vector<16x1xi32> to vector<16x128xi32>
    %7 = arith.cmpi eq, %6, %5 : vector<16x128xi32>
    %8 = arith.extui %7 : vector<16x128xi1> to vector<16x128xi32>
    %9 = arith.sitofp %8 : vector<16x128xi32> to vector<16x128xf32>
    %10 = vector.shape_cast %9 : vector<16x128xf32> to vector<2x8x128xf32>
    %cst = arith.constant dense<0.000000e+00> : vector<2x128xf32>
    %11 = vector.multi_reduction <add>, %10, %cst [1] : vector<2x8x128xf32> to vector<2x128xf32>
    %c0_1 = arith.constant 0 : index
    %c0_2 = arith.constant 0 : index
    %12 = vector.load %arg2[%c0_1, %c0_2] : memref<128x128xf32, #tpu.memory_space<vmem>>, vector<128x128xf32>
    %cst_3 = arith.constant dense<0.000000e+00> : vector<2x128xf32>
    %13 = tpu.matmul %11, %12, %cst_3 {dimension_numbers = #tpu.dot_dimension_numbers<[1], [0], [0], [1], [0, 0, 1, 1], [], []>} : vector<2x128xf32>, vector<128x128xf32>, vector<2x128xf32> -> vector<2x128xf32>
    %c0_4 = arith.constant 0 : index
    %c0_5 = arith.constant 0 : index
    %14 = vector.load %arg3[%c0_4, %c0_5] : memref<1x128xf32, #tpu.memory_space<vmem>>, vector<1x128xf32>
    %15 = vector.broadcast %14 : vector<1x128xf32> to vector<2x128xf32>
    %16 = arith.addf %13, %15 : vector<2x128xf32>
    %c0_6 = arith.constant 0 : index
    %c0_7 = arith.constant 0 : index
    %17 = vector.load %arg4[%c0_6, %c0_7] : memref<2x128xf32, #tpu.memory_space<vmem>>, vector<2x128xf32>
    tpu.vector_store %arg4[%c0_6, %c0_7], %16 {strides = array<i32>} : memref<2x128xf32, #tpu.memory_space<vmem>>, vector<2x128xf32>,
    return
  }
  func.func @transform_0(%arg0: i32) -> (i32, i32) {
    %c0_i32 = arith.constant 0 : i32
    %c0_i32_0 = arith.constant 0 : i32
    return %arg0, %c0_i32 : i32, i32
  }
  func.func @transform_1(%arg0: i32) -> (i32, i32) {
    %c0_i32 = arith.constant 0 : i32
    %c0_i32_0 = arith.constant 0 : i32
    %c0_i32_1 = arith.constant 0 : i32
    return %c0_i32, %c0_i32_0 : i32, i32
  }
  func.func @transform_2(%arg0: i32) -> (i32, i32) {
    %c0_i32 = arith.constant 0 : i32
    %c0_i32_0 = arith.constant 0 : i32
    %c0_i32_1 = arith.constant 0 : i32
    return %c0_i32, %c0_i32_0 : i32, i32
  }
  func.func @transform_3(%arg0: i32) -> (i32, i32) {
    %c0_i32 = arith.constant 0 : i32
    %c0_i32_0 = arith.constant 0 : i32
    return %arg0, %c0_i32 : i32, i32
  }
}

</mosaic_0001>

<bundles_post_ra>
// kernel: classifier_forward.1
= control target key start
LH: loop header
LB: loop body
LE: loop exit
PB: predicated region body
PF: predicated region fallthrough
CT: control target
= control target key end

     0   :  { %8 = vsyncpa [#allocation3], 0  ;;  %s376_s0 = inlined_call_operand.vmem [shape: s32[16,1], index: 0, kind: input, shape index: {}]   ;;  %s377_s1 = inlined_call_operand.hbm [shape: f32[128,128], index: 1, kind: input, shape index: {}]   ;;  %s378_s2 = inlined_call_operand.vmem [shape: f32[1,128], index: 2, kind: input, shape index: {}]   ;;  %s379_s3 = inlined_call_operand.hbm [shape: f32[2,128], index: 3, kind: output, shape index: {}]  }
   0x1   :  { %9 = vsyncpa [#allocation4], 0  ;;  %s315_s12 = smov [#allocation2]   ;;  %s267_s16 = scalar_lea.hbm %s377_s1, 2048 }
   0x2   :  { %s17_s13 = sshll.u32 %s315_s12, 4  ;;  %p268_p0 = scmp.ne.s32.totalorder %s377_s1, %s267_s16  ;;  %s18_s13 = int_to_ptr.vmem [resolvable:$true] %s17_s13 }
   0x3   :  { %p271_p1 = scmp.lt.u32.totalorder %s267_s16, %s377_s1 }
   0x5   :  { %p273_p2 = pnand %p271_p1, %p268_p0 }
   0x7   :  { %276 = shalt.err (!%p273_p2)
}
   0x8   :  { %s277_s21 = scalar_lea.vmem %s18_s13, 2048  ;;  %p282_p4 = scmp.lt.s32.totalorder %s18_s13, %s18_s13 }
   0x9   :  { %p278_p3 = scmp.ne.s32.totalorder %s18_s13, %s277_s21  ;;  %p283_p5 = scmp.lt.s32.totalorder %s277_s21, %s277_s21 }
   0xb   :  { %p284_p6 = por %p283_p5, %p282_p4 }
   0xd   :  { %p285_p7 = pnand %p284_p6, %p278_p3 }
   0xf   :  { %288 = shalt.err (!%p285_p7)
}
  0x10   :  { %s316_s22 = smov 128   ;;  %s317_s23 = smov 8  }
  0x11   :  { %23 = dma.hbm_to_vmem [thread:$0]  %s377_s1, 2048, %s18_s13, [#allocation3], %s316_s22, %s316_s22, %s317_s23  }
  0x12   :  { %311 = dma.done.wait [#allocation3], 2048  }
  0x13   :  { %312 = vsyncadd [#allocation3], 4294965248  ;;  %v318_v0 = vmov 0   ;;  %v319_v1 = vmov 0.0|0.0   ;;  %v29_v2 = vld [vmem:[%s376_s0] sm:$0xff]  ;;  %v30_v3 = vld [vmem:[%s376_s0 + $0x8] sm:$0xff]  ;;  %v39_v33 = vlaneseq }
  0x14   :  { %266 = vset.pattern.permute.xlu0 %v318_v0  ;;  %234 = vmatprep.subr.bf16.mxu0 %v319_v1  ;;  %v65_v4 = vld [vmem:[#allocation2] sm:$0xff]  ;;  %vm31_vm0 = vcmp.gt.s32.totalorder %v29_v2, 0  ;;  %vm33_vm1 = vcmp.gt.s32.totalorder %v30_v3, 0  ;;  %v66_v5 = vld [vmem:[#allocation2 + $0x8] sm:$0xff]  ;;  %v67_v6 = vld [vmem:[#allocation2 + $0x10] sm:$0xff]  ;;  %vm320_vm4 = vmmov 0  }
  0x15   :  { %v68_v7 = vld [vmem:[#allocation2 + $0x18] sm:$0xff]  ;;  %v32_v8 = vsel %vm31_vm0, %v29_v2, 0  ;;  %v34_v9 = vsel %vm33_vm1, %v30_v3, 0  ;;  %v235_v10 = vpack.c.bf16 %v66_v5, %v65_v4  ;;  %v69_v13 = vld [vmem:[#allocation2 + $0x20] sm:$0xff]  ;;  %v70_v14 = vld [vmem:[#allocation2 + $0x28] sm:$0xff]  ;;  %v321_v26 = vmov 0.0  }
  0x16   :  { %vm35_vm2 = vcmp.lt.s32.totalorder %v32_v8, 127  ;;  %vm37_vm3 = vcmp.lt.s32.totalorder %v34_v9, 127  ;;  %v238_v12 = vpack.c.bf16 %v68_v7, %v67_v6  ;;  %v241_v16 = vpack.c.bf16 %v70_v14, %v69_v13  ;;  %v71_v17 = vld [vmem:[#allocation2 + $0x30] sm:$0xff]  ;;  %v72_v18 = vld [vmem:[#allocation2 + $0x38] sm:$0xff]  ;;  %v73_v20 = vld [vmem:[#allocation2 + $0x40] sm:$0xff]  ;;  %231 = vmatprep.mubr.msk.f32.mxu0 %vm320_vm4, %v321_v26  ;;  %s322_s30 = smov [#allocation5]  }
  0x17   :  { %v36_v11 = vsel %vm35_vm2, %v32_v8, 127  ;;  %236 = vmatpush3.bf16.msra.mxu0 %v235_v10  ;;  %v38_v15 = vsel %vm37_vm3, %v34_v9, 127  ;;  %v244_v19 = vpack.c.bf16 %v72_v18, %v71_v17  ;;  %v74_v21 = vld [vmem:[#allocation2 + $0x48] sm:$0xff]  ;;  %v75_v23 = vld [vmem:[#allocation2 + $0x50] sm:$0xff]  ;;  %v76_v24 = vld [vmem:[#allocation2 + $0x58] sm:$0xff]  ;;  %v40_v34 = vand.u32 127, %v39_v33 }
  0x18   :  { %42 = vperm.xlu0 %266, %v36_v11   ;;  %237 = vmatprep.subr.bf16.mxu0 %v319_v1  ;;  %v247_v22 = vpack.c.bf16 %v74_v21, %v73_v20  ;;  %v250_v25 = vpack.c.bf16 %v76_v24, %v75_v23  ;;  %v77_v27 = vld [vmem:[#allocation2 + $0x60] sm:$0xff]  ;;  %v78_v28 = vld [vmem:[#allocation2 + $0x68] sm:$0xff]  ;;  %v79_v30 = vld [vmem:[#allocation2 + $0x70] sm:$0xff]  ;;  %vm90_vm7 = vcmask 1041409   ;;  %s170_s4 = sshll.u32 %s322_s30, 4  ;;  %s171_s4 = int_to_ptr.vmem [resolvable:$true] %s170_s4 }
  0x19   :  { %v253_v29 = vpack.c.bf16 %v78_v28, %v77_v27  ;;  %v80_v31 = vld [vmem:[#allocation2 + $0x78] sm:$0xff]  ;;  %v181_v52 = vld [vmem:[%s378_s2] ss:$0 sm:$0xff]  ;;  %s289_s5 = scalar_lea.vmem %s171_s4, 32  ;;  %p294_p9 = scmp.lt.s32.totalorder %s171_s4, %s171_s4 }
  0x1a   :  { %v256_v32 = vpack.c.bf16 %v80_v31, %v79_v30  ;;  %p290_p8 = scmp.ne.s32.totalorder %s171_s4, %s289_s5  ;;  %p295_p10 = scmp.lt.s32.totalorder %s289_s5, %s289_s5 }
  0x1b   :  { %239 = vmatpush3.bf16.msra.mxu0 %v238_v12 }
  0x1c   :  { %45 = vperm.xlu0 %266, %v38_v15   ;;  %240 = vmatprep.subr.bf16.mxu0 %v319_v1  ;;  %p296_p11 = por %p295_p10, %p294_p9 }
  0x1e   :  { %p297_p12 = pnand %p296_p11, %p290_p8 }
  0x1f   :  { %242 = vmatpush3.bf16.msra.mxu0 %v241_v16 }
  0x20   :  { %243 = vmatprep.subr.bf16.mxu0 %v319_v1 }
  0x23   :  { %245 = vmatpush3.bf16.msra.mxu0 %v244_v19 }
  0x24   :  { %246 = vmatprep.subr.bf16.mxu0 %v319_v1 }
  0x27   :  { %248 = vmatpush3.bf16.msra.mxu0 %v247_v22 }
  0x28   :  { %249 = vmatprep.subr.bf16.mxu0 %v319_v1 }
  0x2b   :  { %251 = vmatpush3.bf16.msra.mxu0 %v250_v25 }
  0x2c   :  { %252 = vmatprep.subr.bf16.mxu0 %v319_v1 }
  0x2f   :  { %254 = vmatpush3.bf16.msra.mxu0 %v253_v29 }
  0x30   :  { %255 = vmatprep.subr.bf16.mxu0 %v319_v1 }
  0x33   :  { %257 = vmatpush3.bf16.msra.mxu0 %v256_v32 }
  0x97   :  { %v43_v35 = vpop.permute.xlu0 %42 }
  0x98   :  { %vm47_vm5 = vcmp.eq.s32.totalorder %v43_v35, %v40_v34 }
  0x99   :  { %v179_v36 = vsel %vm47_vm5, 1.0, %v321_v26 }
  0x9a   :  { %v53_v37 = vrot.slane %v179_v36, 4 }
  0x9b   :  { %v46_v38 = vpop.permute.xlu0 %45 }
  0x9c   :  { %v54_v39 = vadd.f32 %v179_v36, %v53_v37  ;;  %vm48_vm6 = vcmp.eq.s32.totalorder %v46_v38, %v40_v34 }
  0x9d   :  { %v180_v40 = vsel %vm48_vm6, 1.0, %v321_v26 }
  0x9e   :  { %v55_v41 = vrot.slane %v54_v39, 2  ;;  %v59_v42 = vrot.slane %v180_v40, 4 }
  0xa0   :  { %v56_v43 = vadd.f32 %v55_v41, %v54_v39  ;;  %v60_v44 = vadd.f32 %v180_v40, %v59_v42 }
  0xa2   :  { %v61_v45 = vrot.slane %v60_v44, 2  ;;  %v57_v46 = vrot.slane %v56_v43, 1 }
  0xa4   :  { %v62_v47 = vadd.f32 %v61_v45, %v60_v44  ;;  %v58_v49 = vadd.f32 %v57_v46, %v56_v43 }
  0xa6   :  { %v63_v48 = vrot.slane %v62_v47, 1 }
  0xa8   :  { %v64_v50 = vadd.f32 %v63_v48, %v62_v47 }
  0xaa   :  { %v91_v51 = vsel %vm90_vm7, %v64_v50, %v58_v49 }
  0xab   :  { %232 = vmatmul.mubr.f32.vlgmr.msra.gmra.mrb[0].mxu0 %v91_v51 }
 0x17e   :  { %v159_v53 = vpop.f32.mrb[0].mxu0 }
 0x17f   :  { %v160_v54 = vadd.f32 %v181_v52, %v159_v53  ;;  %v233_v55 = vpop.f32.mrb[1].mxu0 }
 0x181   :  { %163 = vst [vmem:[#allocation5] sm:$0x3] %v160_v54 }
 0x182   :  { %300 = shalt.err (!%p297_p12)
}
 0x183   :  { %s301_s8 = scalar_lea.hbm %s379_s3, 32 }
 0x184   :  { %p302_p13 = scmp.ne.s32.totalorder %s379_s3, %s301_s8  ;;  %p305_p0 = scmp.lt.u32.totalorder %s301_s8, %s379_s3 }
 0x186   :  { %p307_p1 = pnand %p305_p0, %p302_p13 }
 0x188   :  { %310 = shalt.err (!%p307_p1)
}
 0x189   :  { %173 = dma.vmem_to_hbm [thread:$0]  %s171_s4, 32, %s379_s3, [#allocation4]  }
 0x18a   :  { %313 = dma.done.wait [#allocation4], 32  }
 0x18b   :  { %314 = vsyncadd [#allocation4], 4294967264 }
 0x18c   :  { %177 = vsyncpa [#allocation3], 1 }
 0x18d   :  { %178 = vsyncpa [#allocation4], 1 }

</bundles_post_ra>
